<compile_context>
chip_gen: v5e
topology: v5e:2x2
jax: 0.10.0
libtpu: 0.0.40
codegen_flags: <defaults>
</compile_context>

<pallas_src>
import functools

import jax
import jax.numpy as jnp
from jax.experimental import pallas as pl
from jax.experimental.pallas import tpu as pltpu

BACKBONE_DIM = 128      # self.backbone_dim
BACKBONE_DIM2 = 128     # self.backbone_dim2
FEATURES_DIM = 128      # features_dim

_LANE = 128
_SUBLANE = 8
# Per-pipeline-buffer budget for the streamed x block (Pallas double-buffers it).
# 8 MiB * 2 buffers + resident weights/outputs/scratch stays comfortably inside the
# raised scoped-VMEM limit on v5e/v6e (128 MiB physical) and v7x (64 MiB physical).
_MAX_X_BLOCK_BYTES = 8 * 1024 * 1024
_VMEM_LIMIT_BYTES = 48 * 1024 * 1024


def _round_up(x, m):
    return ((x + m - 1) // m) * m


def _spatial_model_kernel(x_ref,            # [TB, CG, THW]  native dtype (streamed)
                          wb_ref, bb_ref,   # backbone linear: [CG, 128], [1, 128]
                          w1_ref, b1_ref,   # head linear 1:   [128, 128], [1, 128]
                          w2_ref, b2_ref,   # head linear 2:   [128, 128], [1, 128]
                          feat_ref,         # out: spa_features     [TB, 128]
                          out_ref,          # out: normalized head  [TB, 128]
                          acc_ref,          # scratch: f32 running spatial sum [TB, CG]
                          *, s_total, thw):
    k = pl.program_id(1)                    # spatial (reduction) axis — last in grid

    @pl.when(k == 0)
    def _init():
        acc_ref[...] = jnp.zeros_like(acc_ref)

    # Upcast in-kernel and accumulate the spatial sum in f32 (v5e's VPU has no
    # bf16, and f32 accumulation keeps the norm check tight).
    x = x_ref[...].astype(jnp.float32)                        # [TB, CG, THW]

    if s_total % thw != 0:
        # Ragged last spatial block: contents past the array edge are unspecified,
        # so zero those lanes before summing.  VPU select is free under mem-bound.
        lane = jax.lax.broadcasted_iota(jnp.int32, x.shape, dimension=2)
        x = jnp.where(k * thw + lane < s_total, x, 0.0)

    acc_ref[...] += jnp.sum(x, axis=-1)                       # [TB, CG]

    @pl.when(k == pl.num_programs(1) - 1)
    def _finalize():
        # 1/(H*W) and the sublane fold are already folded into wb_ref.
        pooled = acc_ref[...]                                 # [TB, CG]
        feat = jnp.dot(pooled, wb_ref[...],
                       preferred_element_type=jnp.float32) + bb_ref[...]
        feat = jnp.maximum(feat, 0.0)                         # ReLU
        feat_ref[...] = feat.astype(feat_ref.dtype)

        # contrastive_head (head='mlp'): Linear -> ReLU -> Linear
        h = jnp.dot(feat, w1_ref[...],
                    preferred_element_type=jnp.float32) + b1_ref[...]
        h = jnp.maximum(h, 0.0)
        o = jnp.dot(h, w2_ref[...],
                    preferred_element_type=jnp.float32) + b2_ref[...]

        # F.normalize(out, dim=-1) == o / max(||o||, 1e-12), via EUP rsqrt.
        sumsq = jnp.sum(o * o, axis=-1, keepdims=True)
        inv_norm = jax.lax.rsqrt(jnp.maximum(sumsq, 1e-24))
        out_ref[...] = (o * inv_norm).astype(out_ref.dtype)


def spatial_model_forward(x, i, params):
    """x: [B, C, H, W].  i: ignored (consumed by the external backbone).
    Returns (spa_features [B, 128], normalized_out [B, 128])."""
    del i  # TODO(synk): `i` is an argument of the external backbone; unused here.
    B, C, H, W = x.shape
    HW = H * W

    # ---- sublane folding: keep the second-minor dim of the streamed block dense ----
    G = 1
    if C < _SUBLANE:
        g = max(1, _SUBLANE // C)
        if g > 1 and HW % g == 0:
            G = g
    CG = C * G
    S = HW // G                                   # lane-dim extent after folding

    # Contiguous NCHW -> [B, CG, S] is a metadata-only reshape (no HBM copy); x is
    # streamed in its native dtype so the kernel read is the only pass over x.
    x_r = x.reshape(B, CG, S)
    itemsize = x_r.dtype.itemsize

    # Fold 1/(H*W) of the mean pool and the sublane fold (row repeat) into wb.
    wb = params["wb"].astype(jnp.float32) * (1.0 / HW)
    if G > 1:
        wb = jnp.repeat(wb, G, axis=0)            # [CG, 128]
    bb = params["bb"].astype(jnp.float32)
    w1 = params["w1"].astype(jnp.float32)
    b1 = params["b1"].astype(jnp.float32)
    w2 = params["w2"].astype(jnp.float32)
    b2 = params["b2"].astype(jnp.float32)

    # ---- tile selection (block * 2 pipeline buffers << 64 MiB v7x VMEM) ----
    if B <= _SUBLANE:
        TB = B                                    # block equals full batch dim
    else:
        # batch rows per block: multiple of 8, capped so even the minimal
        # (TB, CG, 128) block respects the per-buffer budget.
        tb_cap = max(_SUBLANE,
                     (_MAX_X_BLOCK_BYTES // (CG * _LANE * itemsize))
                     // _SUBLANE * _SUBLANE)
        TB = min(256, (B // _SUBLANE) * _SUBLANE, tb_cap)

    if S <= _LANE:
        THW = S                                   # single spatial block, full extent
    else:
        max_thw = max(_LANE,
                      (_MAX_X_BLOCK_BYTES // (TB * CG * itemsize))
                      // _LANE * _LANE)
        THW = min(_round_up(S, _LANE), max_thw)

    grid = (pl.cdiv(B, TB), pl.cdiv(S, THW))

    cost = pl.CostEstimate(
        flops=int(2 * B * CG * S
                  + 2 * B * (CG * BACKBONE_DIM
                             + BACKBONE_DIM * BACKBONE_DIM2
                             + BACKBONE_DIM2 * FEATURES_DIM)),
        transcendentals=int(B),
        bytes_accessed=int(x_r.size * itemsize
                           + 4 * (wb.size + bb.size + w1.size + b1.size
                                  + w2.size + b2.size)
                           + 4 * B * (BACKBONE_DIM + FEATURES_DIM)),
    )

    kernel = functools.partial(_spatial_model_kernel, s_total=S, thw=THW)

    feat, out = pl.pallas_call(
        kernel,
        out_shape=(
            jax.ShapeDtypeStruct((B, BACKBONE_DIM), jnp.float32),
            jax.ShapeDtypeStruct((B, FEATURES_DIM), jnp.float32),
        ),
        grid_spec=pltpu.PrefetchScalarGridSpec(
            num_scalar_prefetch=0,
            grid=grid,
            in_specs=[
                pl.BlockSpec((TB, CG, THW), lambda i, k: (i, 0, k)),
                # constant index maps: weights DMA'd once, stay VMEM-resident
                pl.BlockSpec(wb.shape, lambda i, k: (0, 0)),
                pl.BlockSpec(bb.shape, lambda i, k: (0, 0)),
                pl.BlockSpec(w1.shape, lambda i, k: (0, 0)),
                pl.BlockSpec(b1.shape, lambda i, k: (0, 0)),
                pl.BlockSpec(w2.shape, lambda i, k: (0, 0)),
                pl.BlockSpec(b2.shape, lambda i, k: (0, 0)),
            ],
            out_specs=(
                pl.BlockSpec((TB, BACKBONE_DIM), lambda i, k: (i, 0)),
                pl.BlockSpec((TB, FEATURES_DIM), lambda i, k: (i, 0)),
            ),
            scratch_shapes=[pltpu.VMEM((TB, CG), jnp.float32)],
        ),
        compiler_params=pltpu.CompilerParams(
            dimension_semantics=("parallel", "arbitrary"),
            vmem_limit_bytes=_VMEM_LIMIT_BYTES,
        ),
        cost_estimate=cost,
    )(x_r, wb, bb, w1, b1, w2, b2)

    return feat, out


def init_params(key, in_channels):
    """Deterministic parameter init (shapes follow SpatialModel.__init__)."""
    ks = jax.random.split(key, 6)
    scale = 0.05
    return {
        # synthetic backbone projection: C -> 128
        "wb": scale * jax.random.normal(ks[0], (in_channels, BACKBONE_DIM), jnp.float32),
        "bb": scale * jax.random.normal(ks[1], (1, BACKBONE_DIM), jnp.float32),
        # contrastive_head (head='mlp'): Linear(128,128) -> ReLU -> Linear(128,128)
        "w1": scale * jax.random.normal(ks[2], (BACKBONE_DIM, BACKBONE_DIM2), jnp.float32),
        "b1": scale * jax.random.normal(ks[3], (1, BACKBONE_DIM2), jnp.float32),
        "w2": scale * jax.random.normal(ks[4], (BACKBONE_DIM2, FEATURES_DIM), jnp.float32),
        "b2": scale * jax.random.normal(ks[5], (1, FEATURES_DIM), jnp.float32),
    }


if __name__ == "__main__":
    key = jax.random.PRNGKey(0)
    kx, kp = jax.random.split(key)

    B, C, H, W = 2, 4, 16, 16
    x = jax.random.normal(kx, (B, C, H, W), jnp.float32)
    i = jnp.zeros((B,), jnp.int32)   # index arg consumed by the (external) backbone
    params = init_params(kp, C)

    spa_features, out = jax.jit(spatial_model_forward)(x, i, params)
    jax.block_until_ready((spa_features, out))

    assert spa_features.shape == (B, BACKBONE_DIM)
    assert out.shape == (B, FEATURES_DIM)
    # normalized output must have unit L2 norm per row
    norms = jnp.linalg.norm(out, axis=-1)
    assert bool(jnp.all(jnp.abs(norms - 1.0) < 1e-4))

    # cross-check against a pure-JAX reference of the same synthetic forward
    pooled_ref = jnp.mean(x.reshape(B, C, H * W), axis=-1)
    feat_ref = jnp.maximum(pooled_ref @ params["wb"] + params["bb"], 0.0)
    h_ref = jnp.maximum(feat_ref @ params["w1"] + params["b1"], 0.0)
    o_ref = h_ref @ params["w2"] + params["b2"]
    o_ref = o_ref / jnp.maximum(jnp.linalg.norm(o_ref, axis=-1, keepdims=True), 1e-12)
    assert bool(jnp.all(jnp.abs(spa_features - feat_ref) < 1e-3))
    assert bool(jnp.all(jnp.abs(out - o_ref) < 1e-3))

    print("KERNEL_OK")
</pallas_src>

<mosaic_0001>
module attributes {stable_mosaic.version = 11 : i64} {
  func.func @_spatial_model_kernel(%arg0: i32, %arg1: i32, %arg2: memref<2x8x128xf32, #tpu.memory_space<vmem>>, %arg3: memref<8x128xf32, #tpu.memory_space<vmem>>, %arg4: memref<1x128xf32, #tpu.memory_space<vmem>>, %arg5: memref<128x128xf32, #tpu.memory_space<vmem>>, %arg6: memref<1x128xf32, #tpu.memory_space<vmem>>, %arg7: memref<128x128xf32, #tpu.memory_space<vmem>>, %arg8: memref<1x128xf32, #tpu.memory_space<vmem>>, %arg9: memref<2x128xf32, #tpu.memory_space<vmem>>, %arg10: memref<2x128xf32, #tpu.memory_space<vmem>>, %arg11: memref<2x8xf32, #tpu.memory_space<vmem>>) attributes {dimension_semantics = [#tpu.dimension_semantics<parallel>, #tpu.dimension_semantics<arbitrary>], iteration_bounds = array<i64: 1, 1>, scalar_prefetch = 0 : i64, scratch_operands = 1 : i64, tpu.core_type = #tpu.core_type<tc>, window_params = [{transform_indices = @transform_0, window_bounds = array<i64: 2, 8, 128>}, {pipeline_mode = #tpu.pipeline_mode<synchronous>, transform_indices = @transform_1, window_bounds = array<i64: 8, 128>}, {pipeline_mode = #tpu.pipeline_mode<synchronous>, transform_indices = @transform_2, window_bounds = array<i64: 1, 128>}, {pipeline_mode = #tpu.pipeline_mode<synchronous>, transform_indices = @transform_3, window_bounds = array<i64: 128, 128>}, {pipeline_mode = #tpu.pipeline_mode<synchronous>, transform_indices = @transform_4, window_bounds = array<i64: 1, 128>}, {pipeline_mode = #tpu.pipeline_mode<synchronous>, transform_indices = @transform_5, window_bounds = array<i64: 128, 128>}, {pipeline_mode = #tpu.pipeline_mode<synchronous>, transform_indices = @transform_6, window_bounds = array<i64: 1, 128>}, {transform_indices = @transform_7, window_bounds = array<i64: 2, 128>}, {transform_indices = @transform_8, window_bounds = array<i64: 2, 128>}]} {
    %c0_i32 = arith.constant 0 : i32
    %0 = arith.cmpi eq, %arg1, %c0_i32 : i32
    %1 = arith.extui %0 : i1 to i32
    %c0_i32_0 = arith.constant 0 : i32
    %2 = arith.cmpi ne, %1, %c0_i32_0 : i32
    scf.if %2 {
      %cst_9 = arith.constant 0.000000e+00 : f32
      %11 = vector.broadcast %cst_9 : f32 to vector<2x8xf32>
      %c0_10 = arith.constant 0 : index
      %c0_11 = arith.constant 0 : index
      %12 = vector.load %arg11[%c0_10, %c0_11] : memref<2x8xf32, #tpu.memory_space<vmem>>, vector<2x8xf32>
      tpu.vector_store %arg11[%c0_10, %c0_11], %11 {strides = array<i32>} : memref<2x8xf32, #tpu.memory_space<vmem>>, vector<2x8xf32>,
    } else {
    }
    %c0 = arith.constant 0 : index
    %c0_1 = arith.constant 0 : index
    %c0_2 = arith.constant 0 : index
    %3 = vector.load %arg2[%c0, %c0_1, %c0_2] : memref<2x8x128xf32, #tpu.memory_space<vmem>>, vector<2x8x128xf32>
    %c0_3 = arith.constant 0 : index
    %c0_4 = arith.constant 0 : index
    %4 = vector.load %arg11[%c0_3, %c0_4] : memref<2x8xf32, #tpu.memory_space<vmem>>, vector<2x8xf32>
    %cst = arith.constant dense<0.000000e+00> : vector<2x8xf32>
    %5 = vector.multi_reduction <add>, %3, %cst [2] : vector<2x8x128xf32> to vector<2x8xf32>
    %6 = arith.addf %4, %5 : vector<2x8xf32>
    %c0_5 = arith.constant 0 : index
    %c0_6 = arith.constant 0 : index
    %7 = vector.load %arg11[%c0_5, %c0_6] : memref<2x8xf32, #tpu.memory_space<vmem>>, vector<2x8xf32>
    tpu.vector_store %arg11[%c0_5, %c0_6], %6 {strides = array<i32>} : memref<2x8xf32, #tpu.memory_space<vmem>>, vector<2x8xf32>,
    %c0_i32_7 = arith.constant 0 : i32
    %8 = arith.cmpi eq, %arg1, %c0_i32_7 : i32
    %9 = arith.extui %8 : i1 to i32
    %c0_i32_8 = arith.constant 0 : i32
    %10 = arith.cmpi ne, %9, %c0_i32_8 : i32
    scf.if %10 {
      %c0_9 = arith.constant 0 : index
      %c0_10 = arith.constant 0 : index
      %11 = vector.load %arg11[%c0_9, %c0_10] : memref<2x8xf32, #tpu.memory_space<vmem>>, vector<2x8xf32>
      %c0_11 = arith.constant 0 : index
      %c0_12 = arith.constant 0 : index
      %12 = vector.load %arg3[%c0_11, %c0_12] : memref<8x128xf32, #tpu.memory_space<vmem>>, vector<8x128xf32>
      %cst_13 = arith.constant dense<0.000000e+00> : vector<2x128xf32>
      %13 = tpu.matmul %11, %12, %cst_13 {dimension_numbers = #tpu.dot_dimension_numbers<[1], [0], [0], [1], [0, 0, 1, 1], [], []>} : vector<2x8xf32>, vector<8x128xf32>, vector<2x128xf32> -> vector<2x128xf32>
      %c0_14 = arith.constant 0 : index
      %c0_15 = arith.constant 0 : index
      %14 = vector.load %arg4[%c0_14, %c0_15] : memref<1x128xf32, #tpu.memory_space<vmem>>, vector<1x128xf32>
      %15 = vector.broadcast %14 : vector<1x128xf32> to vector<2x128xf32>
      %16 = arith.addf %13, %15 : vector<2x128xf32>
      %cst_16 = arith.constant 0.000000e+00 : f32
      %17 = vector.broadcast %cst_16 : f32 to vector<2x128xf32>
      %18 = arith.maximumf %16, %17 : vector<2x128xf32>
      %c0_17 = arith.constant 0 : index
      %c0_18 = arith.constant 0 : index
      %19 = vector.load %arg9[%c0_17, %c0_18] : memref<2x128xf32, #tpu.memory_space<vmem>>, vector<2x128xf32>
      tpu.vector_store %arg9[%c0_17, %c0_18], %18 {strides = array<i32>} : memref<2x128xf32, #tpu.memory_space<vmem>>, vector<2x128xf32>,
      %c0_19 = arith.constant 0 : index
      %c0_20 = arith.constant 0 : index
      %20 = vector.load %arg5[%c0_19, %c0_20] : memref<128x128xf32, #tpu.memory_space<vmem>>, vector<128x128xf32>
      %cst_21 = arith.constant dense<0.000000e+00> : vector<2x128xf32>
      %21 = tpu.matmul %18, %20, %cst_21 {dimension_numbers = #tpu.dot_dimension_numbers<[1], [0], [0], [1], [0, 0, 1, 1], [], []>} : vector<2x128xf32>, vector<128x128xf32>, vector<2x128xf32> -> vector<2x128xf32>
      %c0_22 = arith.constant 0 : index
      %c0_23 = arith.constant 0 : index
      %22 = vector.load %arg6[%c0_22, %c0_23] : memref<1x128xf32, #tpu.memory_space<vmem>>, vector<1x128xf32>
      %23 = vector.broadcast %22 : vector<1x128xf32> to vector<2x128xf32>
      %24 = arith.addf %21, %23 : vector<2x128xf32>
      %cst_24 = arith.constant 0.000000e+00 : f32
      %25 = vector.broadcast %cst_24 : f32 to vector<2x128xf32>
      %26 = arith.maximumf %24, %25 : vector<2x128xf32>
      %c0_25 = arith.constant 0 : index
      %c0_26 = arith.constant 0 : index
      %27 = vector.load %arg7[%c0_25, %c0_26] : memref<128x128xf32, #tpu.memory_space<vmem>>, vector<128x128xf32>
      %cst_27 = arith.constant dense<0.000000e+00> : vector<2x128xf32>
      %28 = tpu.matmul %26, %27, %cst_27 {dimension_numbers = #tpu.dot_dimension_numbers<[1], [0], [0], [1], [0, 0, 1, 1], [], []>} : vector<2x128xf32>, vector<128x128xf32>, vector<2x128xf32> -> vector<2x128xf32>
      %c0_28 = arith.constant 0 : index
      %c0_29 = arith.constant 0 : index
      %29 = vector.load %arg8[%c0_28, %c0_29] : memref<1x128xf32, #tpu.memory_space<vmem>>, vector<1x128xf32>
      %30 = vector.broadcast %29 : vector<1x128xf32> to vector<2x128xf32>
      %31 = arith.addf %28, %30 : vector<2x128xf32>
      %32 = arith.mulf %31, %31 : vector<2x128xf32>
      %cst_30 = arith.constant dense<0.000000e+00> : vector<2xf32>
      %33 = vector.multi_reduction <add>, %32, %cst_30 [1] : vector<2x128xf32> to vector<2xf32>
      %34 = vector.shape_cast %33 : vector<2xf32> to vector<2x1xf32>
      %cst_31 = arith.constant 1.000000e-24 : f32
      %35 = vector.broadcast %cst_31 : f32 to vector<2x1xf32>
      %36 = arith.maximumf %34, %35 : vector<2x1xf32>
      %37 = math.rsqrt %36 : vector<2x1xf32>
      %38 = vector.broadcast %37 : vector<2x1xf32> to vector<2x128xf32>
      %39 = arith.mulf %31, %38 : vector<2x128xf32>
      %c0_32 = arith.constant 0 : index
      %c0_33 = arith.constant 0 : index
      %40 = vector.load %arg10[%c0_32, %c0_33] : memref<2x128xf32, #tpu.memory_space<vmem>>, vector<2x128xf32>
      tpu.vector_store %arg10[%c0_32, %c0_33], %39 {strides = array<i32>} : memref<2x128xf32, #tpu.memory_space<vmem>>, vector<2x128xf32>,
    } else {
    }
    return
  }
  func.func @transform_0(%arg0: i32, %arg1: i32) -> (i32, i32, i32) {
    %c0_i32 = arith.constant 0 : i32
    %c0_i32_0 = arith.constant 0 : i32
    return %arg0, %c0_i32, %arg1 : i32, i32, i32
  }
  func.func @transform_1(%arg0: i32, %arg1: i32) -> (i32, i32) {
    %c0_i32 = arith.constant 0 : i32
    %c0_i32_0 = arith.constant 0 : i32
    %c0_i32_1 = arith.constant 0 : i32
    return %c0_i32, %c0_i32_0 : i32, i32
  }
  func.func @transform_2(%arg0: i32, %arg1: i32) -> (i32, i32) {
    %c0_i32 = arith.constant 0 : i32
    %c0_i32_0 = arith.constant 0 : i32
    %c0_i32_1 = arith.constant 0 : i32
    return %c0_i32, %c0_i32_0 : i32, i32
  }
  func.func @transform_3(%arg0: i32, %arg1: i32) -> (i32, i32) {
    %c0_i32 = arith.constant 0 : i32
    %c0_i32_0 = arith.constant 0 : i32
    %c0_i32_1 = arith.constant 0 : i32
    return %c0_i32, %c0_i32_0 : i32, i32
  }
  func.func @transform_4(%arg0: i32, %arg1: i32) -> (i32, i32) {
    %c0_i32 = arith.constant 0 : i32
    %c0_i32_0 = arith.constant 0 : i32
    %c0_i32_1 = arith.constant 0 : i32
    return %c0_i32, %c0_i32_0 : i32, i32
  }
  func.func @transform_5(%arg0: i32, %arg1: i32) -> (i32, i32) {
    %c0_i32 = arith.constant 0 : i32
    %c0_i32_0 = arith.constant 0 : i32
    %c0_i32_1 = arith.constant 0 : i32
    return %c0_i32, %c0_i32_0 : i32, i32
  }
  func.func @transform_6(%arg0: i32, %arg1: i32) -> (i32, i32) {
    %c0_i32 = arith.constant 0 : i32
    %c0_i32_0 = arith.constant 0 : i32
    %c0_i32_1 = arith.constant 0 : i32
    return %c0_i32, %c0_i32_0 : i32, i32
  }
  func.func @transform_7(%arg0: i32, %arg1: i32) -> (i32, i32) {
    %c0_i32 = arith.constant 0 : i32
    %c0_i32_0 = arith.constant 0 : i32
    return %arg0, %c0_i32 : i32, i32
  }
  func.func @transform_8(%arg0: i32, %arg1: i32) -> (i32, i32) {
    %c0_i32 = arith.constant 0 : i32
    %c0_i32_0 = arith.constant 0 : i32
    return %arg0, %c0_i32 : i32, i32
  }
}

</mosaic_0001>

<bundles_post_ra>
// kernel: spatial_model_forward.1
= control target key start
LH: loop header
LB: loop body
LE: loop exit
PB: predicated region body
PF: predicated region fallthrough
CT: control target
= control target key end

     0   :  { %14 = vsyncpa [#allocation4], 0  ;;  %s456_s0 = inlined_call_operand.vmem [shape: f32[2,8,128], index: 0, kind: input, shape index: {}]   ;;  %s457_s1 = inlined_call_operand.vmem [shape: f32[8,128], index: 1, kind: input, shape index: {}]   ;;  %s458_s2 = inlined_call_operand.vmem [shape: f32[1,128], index: 2, kind: input, shape index: {}]   ;;  %s459_s3 = inlined_call_operand.vmem [shape: f32[128,128], index: 3, kind: input, shape index: {}]   ;;  %s460_s4 = inlined_call_operand.vmem [shape: f32[1,128], index: 4, kind: input, shape index: {}]   ;;  %s461_s5 = inlined_call_operand.hbm [shape: f32[128,128], index: 5, kind: input, shape index: {}]   ;;  %s462_s6 = inlined_call_operand.vmem [shape: f32[1,128], index: 6, kind: input, shape index: {}]   ;;  %s463_s7 = inlined_call_operand.hbm [shape: f32[2,128], index: 7, kind: output, shape index: {0}]   ;;  %s464_s8 = inlined_call_operand.hbm [shape: f32[2,128], index: 8, kind: output, shape index: {1}]  }
   0x1   :  { %15 = vsyncpa [#allocation5], 0 }
   0x2   :  { %16 = vsyncpa [#allocation8], 0  ;;  %s31_s29 = sshll.u32 %s461_s5, 4  ;;  %s328_s30 = smov [#allocation3]   ;;  %s32_s29 = int_to_ptr.hbm [resolvable:$true] %s31_s29 }
   0x3   :  { %s33_s9 = sshll.u32 %s328_s30, 4  ;;  %s329_s10 = smov 128   ;;  %s34_s9 = int_to_ptr.vmem [resolvable:$true] %s33_s9 }
   0x4   :  { %s330_s11 = smov 8  }
   0x5   :  { %39 = dma.hbm_to_vmem [thread:$0]  %s32_s29, 2048, %s34_s9, [#allocation4], %s329_s10, %s329_s10, %s330_s11  }
   0x6   :  { %322 = dma.done.wait [#allocation4], 2048  }
   0x7   :  { %323 = vsyncadd [#allocation4], 4294965248  ;;  %v52_v0 = vld [vmem:[%s456_s0] sm:$0xff]  ;;  %v53_v1 = vld [vmem:[%s456_s0 + $0x8] sm:$0xff]  ;;  %vm50_vm0 = vcmask 58368   ;;  %v331_v2 = vmov 0.0   ;;  %v61_v12 = vlaneseq }
   0x8   :  { %55 = vadd.xlane.f32.xlu0 %v52_v0  ;;  %51 = vst.msk [vmem:[#allocation2] sm:$0x3] %vm50_vm0, %v331_v2  ;;  %v75_v3 = vld [vmem:[%s457_s1] sm:$0xff]  ;;  %v121_v4 = vld [vmem:[%s459_s3 + $0x78] sm:$0xff]  ;;  %v120_v5 = vld [vmem:[%s459_s3 + $0x70] sm:$0xff]  ;;  %vm65_vm1 = vcmask 1041409  }
   0x9   :  { %99 = vmatpush.msra.mxu0 %v75_v3  ;;  %126 = vmatpush.msra.mxu1 %v121_v4  ;;  %v119_v6 = vld [vmem:[%s459_s3 + $0x68] sm:$0xff]  ;;  %v118_v7 = vld [vmem:[%s459_s3 + $0x60] sm:$0xff]  ;;  %v117_v8 = vld [vmem:[%s459_s3 + $0x58] sm:$0xff]  ;;  %v62_v15 = vand.u32 127, %v61_v12  ;;  %vm80_vm2 = vcmask 64512   ;;  %vm188_vm3 = vcmask 1041408  }
   0xa   :  { %v116_v9 = vld [vmem:[%s459_s3 + $0x50] sm:$0xff]  ;;  %v115_v11 = vld [vmem:[%s459_s3 + $0x48] sm:$0xff]  ;;  %v114_v13 = vld [vmem:[%s459_s3 + $0x40] sm:$0xff]  ;;  %s212_s28 = sshll.u32 %s463_s7, 4  ;;  %s332_s29 = smov [#allocation6]   ;;  %s213_s28 = int_to_ptr.hbm [resolvable:$true] %s212_s28 }
   0xb   :  { %127 = vmatpush.msra.mxu1 %v120_v5  ;;  %v113_v14 = vld [vmem:[%s459_s3 + $0x38] sm:$0xff]  ;;  %v112_v16 = vld [vmem:[%s459_s3 + $0x30] sm:$0xff]  ;;  %v111_v18 = vld [vmem:[%s459_s3 + $0x28] sm:$0xff]  ;;  %s223_s10 = sshll.u32 %s464_s8, 4  ;;  %s224_s10 = int_to_ptr.hbm [resolvable:$true] %s223_s10 }
   0xc   :  { %v110_v22 = vld [vmem:[%s459_s3 + $0x20] sm:$0xff]  ;;  %v109_v25 = vld [vmem:[%s459_s3 + $0x18] sm:$0xff]  ;;  %v108_v27 = vld [vmem:[%s459_s3 + $0x10] sm:$0xff] }
   0xd   :  { %128 = vmatpush.msra.mxu1 %v119_v6  ;;  %v107_v28 = vld [vmem:[%s459_s3 + $0x8] sm:$0xff]  ;;  %v106_v29 = vld [vmem:[%s459_s3] sm:$0xff]  ;;  %v161_v31 = vld [vmem:[#allocation3 + $0x70] sm:$0xff] }
   0xe   :  { %v162_v30 = vld [vmem:[#allocation3 + $0x78] sm:$0xff]  ;;  %v160_v32 = vld [vmem:[#allocation3 + $0x68] sm:$0xff]  ;;  %v159_v33 = vld [vmem:[#allocation3 + $0x60] sm:$0xff] }
   0xf   :  { %129 = vmatpush.msra.mxu1 %v118_v7  ;;  %v54_v20 = vld [vmem:[#allocation2] sm:$0x3]  ;;  %167 = vmatpush.msra.mxu2 %v162_v30  ;;  %v157_v35 = vld [vmem:[#allocation3 + $0x50] sm:$0xff]  ;;  %v156_v36 = vld [vmem:[#allocation3 + $0x48] sm:$0xff] }
  0x10   :  { %57 = vadd.xlane.f32.xlu0 %v53_v1  ;;  %v158_v34 = vld [vmem:[#allocation3 + $0x58] sm:$0xff]  ;;  %v155_v37 = vld [vmem:[#allocation3 + $0x40] sm:$0xff]  ;;  %v153_v39 = vld [vmem:[#allocation3 + $0x30] sm:$0xff] }
  0x11   :  { %130 = vmatpush.msra.mxu1 %v117_v8  ;;  %168 = vmatpush.msra.mxu2 %v161_v31  ;;  %v154_v38 = vld [vmem:[#allocation3 + $0x38] sm:$0xff]  ;;  %v152_v40 = vld [vmem:[#allocation3 + $0x28] sm:$0xff]  ;;  %v151_v41 = vld [vmem:[#allocation3 + $0x20] sm:$0xff] }
  0x12   :  { %v150_v42 = vld [vmem:[#allocation3 + $0x18] sm:$0xff]  ;;  %v149_v47 = vld [vmem:[#allocation3 + $0x10] sm:$0xff]  ;;  %v148_v48 = vld [vmem:[#allocation3 + $0x8] sm:$0xff] }
  0x13   :  { %131 = vmatpush.msra.mxu1 %v116_v9  ;;  %169 = vmatpush.msra.mxu2 %v160_v32  ;;  %v245_v43 = vld [vmem:[%s458_s2] ss:$0 sm:$0xff]  ;;  %v147_v49 = vld [vmem:[#allocation3] sm:$0xff] }
  0x14   :  { %v246_v50 = vld [vmem:[%s460_s4] ss:$0 sm:$0xff]  ;;  %s210_s4 = sshll.u32 %s332_s29, 4  ;;  %s211_s4 = int_to_ptr.vmem [resolvable:$true] %s210_s4 }
  0x15   :  { %132 = vmatpush.msra.mxu1 %v115_v11  ;;  %170 = vmatpush.msra.mxu2 %v159_v33  ;;  %v247_v54 = vld [vmem:[%s462_s6] ss:$0 sm:$0xff]  ;;  %s333_s6 = smov [#allocation7]  }
  0x16   :  { %s221_s30 = sshll.u32 %s333_s6, 4  ;;  %s222_s30 = int_to_ptr.vmem [resolvable:$true] %s221_s30 }
  0x17   :  { %133 = vmatpush.msra.mxu1 %v114_v13  ;;  %171 = vmatpush.msra.mxu2 %v158_v34 }
  0x19   :  { %134 = vmatpush.msra.mxu1 %v113_v14  ;;  %172 = vmatpush.msra.mxu2 %v157_v35 }
  0x1b   :  { %135 = vmatpush.msra.mxu1 %v112_v16  ;;  %173 = vmatpush.msra.mxu2 %v156_v36 }
  0x1d   :  { %136 = vmatpush.msra.mxu1 %v111_v18  ;;  %174 = vmatpush.msra.mxu2 %v155_v37 }
  0x1f   :  { %137 = vmatpush.msra.mxu1 %v110_v22  ;;  %175 = vmatpush.msra.mxu2 %v154_v38 }
  0x21   :  { %138 = vmatpush.msra.mxu1 %v109_v25  ;;  %176 = vmatpush.msra.mxu2 %v153_v39 }
  0x23   :  { %139 = vmatpush.msra.mxu1 %v108_v27  ;;  %177 = vmatpush.msra.mxu2 %v152_v40 }
  0x25   :  { %140 = vmatpush.msra.mxu1 %v107_v28  ;;  %178 = vmatpush.msra.mxu2 %v151_v41 }
  0x27   :  { %141 = vmatpush.msra.mxu1 %v106_v29  ;;  %179 = vmatpush.msra.mxu2 %v150_v42 }
  0x29   :  { %180 = vmatpush.msra.mxu2 %v149_v47 }
  0x2b   :  { %181 = vmatpush.msra.mxu2 %v148_v48 }
  0x2d   :  { %182 = vmatpush.msra.mxu2 %v147_v49 }
  0x7b   :  { %v56_v10 = vpop.xlane.xlu0 %55 }
  0x7c   :  { %v63_v19 = vperm.slane %v56_v10, %v62_v15 }
  0x83   :  { %v58_v17 = vpop.xlane.xlu0 %57 }
  0x84   :  { %v64_v21 = vperm.slane %v58_v17, %v62_v15 }
  0x86   :  { %v66_v23 = vsel %vm65_vm1, %v64_v21, %v63_v19 }
  0x87   :  { %v68_v24 = vadd.f32 %v66_v23, %v54_v20 }
  0x89   :  { %70 = vst.msk [vmem:[#allocation2] sm:$0x3] %vm50_vm0, %v68_v24 }
  0x90   :  { %v74_v26 = vld [vmem:[#allocation2] sm:$0x3] }
  0x91   :  { %238 = vmatmul.msk.f32.vlgmr.msra.gmra.mxu0 %vm80_vm2, %v74_v26 }
 0x10e   :  { %v101_v44 = vpop.f32.mrf.mxu0 }
 0x10f   :  { %v102_v45 = vadd.f32 %v245_v43, %v101_v44 }
 0x111   :  { %v104_v46 = vmax.f32 %v102_v45, 0.0 }
 0x113   :  { %105 = vst [vmem:[#allocation6] sm:$0x3] %v104_v46  ;;  %142 = vmatmul.f32.vlgmr.msra.gmra.mxu1 %v104_v46 }
 0x114   :  { %215 = dma.vmem_to_hbm [thread:$0]  %s211_s4, 32, %s213_s28, [#allocation5]  }
 0x190   :  { %v143_v51 = vpop.f32.mrf.mxu1 }
 0x191   :  { %v144_v52 = vadd.f32 %v246_v50, %v143_v51 }
 0x193   :  { %v146_v53 = vmax.f32 %v144_v52, 0.0 }
 0x195   :  { %183 = vmatmul.f32.vlgmr.msra.gmra.mxu2 %v146_v53 }
 0x218   :  { %v184_v55 = vpop.f32.mrf.mxu2 }
 0x219   :  { %v185_v56 = vadd.f32 %v247_v54, %v184_v55 }
 0x21b   :  { %v187_v57 = vmul.f32 %v185_v56, %v185_v56 }
 0x21d   :  { %v189_v58 = vsel %vm188_vm3, %v187_v57, 0.0 }
 0x21e   :  { %190 = vadd.xlane.f32.xlu1 %v189_v58 }
 0x291   :  { %v191_v59 = vpop.xlane.xlu1 %190 }
 0x292   :  { %v192_v60 = vmax.f32 %v191_v59, 1e-24 }
 0x294   :  { %248 = vrsqrt.f32 %v192_v60  ;;  %vm199_vm5 = vweird.f32 %v192_v60 }
 0x29a   :  { %v249_v61 = vpop.eup %248 }
 0x29b   :  { %v194_v62 = vmul.f32 %v249_v61, %v192_v60  ;;  %vm200_vm4 = vweird.f32 %v249_v61 }
 0x29c   :  { %vm201_vm6 = vmor %vm199_vm5, %vm200_vm4 }
 0x29d   :  { %v195_v63 = vmul.f32 %v249_v61, %v194_v62 }
 0x29f   :  { %v196_v0 = vmul.f32 0.5, %v195_v63 }
 0x2a1   :  { %v197_v1 = vsub.f32 1.5, %v196_v0 }
 0x2a3   :  { %v198_v2 = vmul.f32 %v249_v61, %v197_v1 }
 0x2a5   :  { %v202_v3 = vsel %vm201_vm6, %v249_v61, %v198_v2 }
 0x2a6   :  { %v203_v4 = vmul.f32 %v202_v3, %v185_v56 }
 0x2a8   :  { %204 = vst [vmem:[#allocation7] sm:$0x3] %v203_v4 }
 0x2a9   :  { %226 = dma.vmem_to_hbm [thread:$0]  %s222_s30, 32, %s224_s10, [#allocation8]  }
 0x2aa   :  { %324 = dma.done.wait [#allocation5], 32  }
 0x2ab   :  { %325 = vsyncadd [#allocation5], 4294967264 }
 0x2ac   :  { %326 = dma.done.wait [#allocation8], 32  }
 0x2ad   :  { %327 = vsyncadd [#allocation8], 4294967264 }
 0x2ae   :  { %235 = vsyncpa [#allocation4], 1 }
 0x2af   :  { %236 = vsyncpa [#allocation5], 1 }
 0x2b0   :  { %237 = vsyncpa [#allocation8], 1 }

</bundles_post_ra>
